<compile_context>
chip_gen: v7x
topology: tpu7x:2x2x1
jax: 0.10.0
libtpu: 0.0.40
codegen_flags: <defaults>
</compile_context>

<pallas_src>
import jax
import jax.numpy as jnp
from jax.experimental import pallas as pl
from jax.experimental.pallas import tpu as pltpu


# ---------------------------------------------------------------------------
# Kernels
# ---------------------------------------------------------------------------

def _fused_kernel(x_ref, w1t_ref, b1_ref, w2t_ref, b2_ref, o_ref):
    # x_ref: (1, C, S_pad)   w1t_ref: (C, Cr) (already scaled by 1/S)
    # b1_ref: (1, Cr)        w2t_ref: (Cr, C)   b2_ref: (1, C)
    x = x_ref[...]                                           # native dtype tile
    pooled = jnp.sum(x.astype(jnp.float32), axis=-1)         # (1, C) f32 sums
    h = jnp.dot(pooled, w1t_ref[...],
                preferred_element_type=jnp.float32) + b1_ref[...]
    h = jnp.maximum(h, 0.0)
    g = jnp.dot(h, w2t_ref[...],
                preferred_element_type=jnp.float32) + b2_ref[...]
    g = jax.nn.sigmoid(g).astype(x.dtype)                    # (1, C)
    o_ref[...] = x * g[:, :, None]                           # dtype-native scale


def _pool_sum_kernel(x_ref, sum_ref):
    # x_ref: (1, C, TS)   sum_ref: (1, 1, C) f32, resident across the spatial axis
    @pl.when(pl.program_id(1) == 0)
    def _():
        sum_ref[...] = jnp.zeros_like(sum_ref)
    partial = jnp.sum(x_ref[...].astype(jnp.float32), axis=-1)   # (1, C)
    sum_ref[...] += partial[:, None, :]


def _gate_kernel(sum_ref, w1t_ref, b1_ref, w2t_ref, b2_ref, gate_ref):
    # sum_ref: (B, 1, C) f32 raw spatial sums (1/S folded into w1t)
    # gate_ref: (B, 1, C) in the input dtype
    pooled = sum_ref[...][:, 0, :]                           # (B, C)
    h = jnp.dot(pooled, w1t_ref[...],
                preferred_element_type=jnp.float32) + b1_ref[...]
    h = jnp.maximum(h, 0.0)
    g = jnp.dot(h, w2t_ref[...],
                preferred_element_type=jnp.float32) + b2_ref[...]
    gate_ref[...] = jax.nn.sigmoid(g).astype(gate_ref.dtype)[:, None, :]


def _scale_kernel(x_ref, gate_ref, o_ref):
    # x_ref: (1, C, TS)   gate_ref: (1, 1, C)   o_ref: (1, C, TS)
    x = x_ref[...]
    g = gate_ref[...][:, 0, :]                               # (1, C), x dtype
    o_ref[...] = x * g[:, :, None]


# ---------------------------------------------------------------------------
# Wrapper
# ---------------------------------------------------------------------------

def _round_up(a, b):
    return (a + b - 1) // b * b


def channel_se_layer_3d(x, w1, b1, w2, b2, *,
                        spatial_tile=None,
                        max_fused_block_bytes=2 * 1024 * 1024):
    """x: (B, C, D, H, W). w1: (Cr, C), b1: (Cr,), w2: (C, Cr), b2: (C,)
    (PyTorch nn.Linear weight layout is (out_features, in_features))."""
    B, C, D, H, W = x.shape
    Cr = w1.shape[0]
    S = D * H * W
    itemsize = jnp.dtype(x.dtype).itemsize

    # Fold the 1/S mean normalization into fc1's weights; pre-transpose to (in, out).
    w1t = (jnp.asarray(w1, jnp.float32) * (1.0 / float(S))).T   # (C, Cr)
    w2t = jnp.asarray(w2, jnp.float32).T                        # (Cr, C)
    b1r = jnp.asarray(b1, jnp.float32).reshape(1, Cr)
    b2r = jnp.asarray(b2, jnp.float32).reshape(1, C)

    # --- choose a lane-dense spatial tile (multiple of 128, ~2 MiB target) ----
    S128 = _round_up(S, 128)
    if spatial_tile is not None:
        TS = max(128, _round_up(int(spatial_tile), 128))
    else:
        target_tile_bytes = 2 * 1024 * 1024
        TS = max(512, (target_tile_bytes // max(1, C * itemsize)) // 128 * 128)
    TS = min(TS, S128)
    S_pad = _round_up(S, TS)
    nS = S_pad // TS

    x3 = x.reshape(B, C, S)
    if S_pad != S:
        x3 = jnp.pad(x3, ((0, 0), (0, 0), (0, S_pad - S)))   # zero pad: sums unaffected

    block_bytes = C * S_pad * itemsize
    vmem_cap = 48 * 1024 * 1024   # safe on v5e/v6e (128 MiB) and v7x (64 MiB) physical

    if block_bytes <= max_fused_block_bytes:
        # ------------------ fused single-pass (traffic optimal) ------------------
        out3 = pl.pallas_call(
            _fused_kernel,
            out_shape=jax.ShapeDtypeStruct((B, C, S_pad), x.dtype),
            grid_spec=pltpu.PrefetchScalarGridSpec(
                num_scalar_prefetch=0,
                grid=(B,),
                in_specs=[
                    pl.BlockSpec((1, C, S_pad), lambda b: (b, 0, 0)),
                    pl.BlockSpec((C, Cr), lambda b: (0, 0)),
                    pl.BlockSpec((1, Cr), lambda b: (0, 0)),
                    pl.BlockSpec((Cr, C), lambda b: (0, 0)),
                    pl.BlockSpec((1, C), lambda b: (0, 0)),
                ],
                out_specs=pl.BlockSpec((1, C, S_pad), lambda b: (b, 0, 0)),
            ),
            compiler_params=pltpu.CompilerParams(
                dimension_semantics=("parallel",),
                vmem_limit_bytes=vmem_cap),
            cost_estimate=pl.CostEstimate(
                flops=int(2 * B * C * S_pad + 4 * B * C * Cr),
                transcendentals=int(B * C),
                bytes_accessed=int(2 * B * C * S_pad * itemsize)),
        )(x3, w1t, b1r, w2t, b2r)
    else:
        # ------------------- tiled pool / gate / scale passes --------------------
        # 1) per-channel sums, accumulated over spatial tiles (reduction axis last)
        pooled = pl.pallas_call(
            _pool_sum_kernel,
            out_shape=jax.ShapeDtypeStruct((B, 1, C), jnp.float32),
            grid_spec=pltpu.PrefetchScalarGridSpec(
                num_scalar_prefetch=0,
                grid=(B, nS),
                in_specs=[pl.BlockSpec((1, C, TS), lambda b, s: (b, 0, s))],
                out_specs=pl.BlockSpec((1, 1, C), lambda b, s: (b, 0, 0)),
            ),
            compiler_params=pltpu.CompilerParams(
                dimension_semantics=("parallel", "arbitrary"),
                vmem_limit_bytes=vmem_cap),
            cost_estimate=pl.CostEstimate(
                flops=int(B * C * S_pad),
                transcendentals=0,
                bytes_accessed=int(B * C * S_pad * itemsize + B * C * 4)),
        )(x3)

        # 2) excitation: one batched matmul for all B rows (hoisted out of hot loop)
        gate = pl.pallas_call(
            _gate_kernel,
            out_shape=jax.ShapeDtypeStruct((B, 1, C), x.dtype),
            grid_spec=pltpu.PrefetchScalarGridSpec(
                num_scalar_prefetch=0,
                grid=(1,),
                in_specs=[
                    pl.BlockSpec((B, 1, C), lambda i: (0, 0, 0)),
                    pl.BlockSpec((C, Cr), lambda i: (0, 0)),
                    pl.BlockSpec((1, Cr), lambda i: (0, 0)),
                    pl.BlockSpec((Cr, C), lambda i: (0, 0)),
                    pl.BlockSpec((1, C), lambda i: (0, 0)),
                ],
                out_specs=pl.BlockSpec((B, 1, C), lambda i: (0, 0, 0)),
            ),
            compiler_params=pltpu.CompilerParams(
                dimension_semantics=("arbitrary",)),
        )(pooled, w1t, b1r, w2t, b2r)

        # 3) mem-bound rescale over a fully parallel (B, nS) grid (megacore friendly)
        out3 = pl.pallas_call(
            _scale_kernel,
            out_shape=jax.ShapeDtypeStruct((B, C, S_pad), x.dtype),
            grid_spec=pltpu.PrefetchScalarGridSpec(
                num_scalar_prefetch=0,
                grid=(B, nS),
                in_specs=[
                    pl.BlockSpec((1, C, TS), lambda b, s: (b, 0, s)),
                    pl.BlockSpec((1, 1, C), lambda b, s: (b, 0, 0)),
                ],
                out_specs=pl.BlockSpec((1, C, TS), lambda b, s: (b, 0, s)),
            ),
            compiler_params=pltpu.CompilerParams(
                dimension_semantics=("parallel", "parallel"),
                vmem_limit_bytes=vmem_cap),
            cost_estimate=pl.CostEstimate(
                flops=int(B * C * S_pad),
                transcendentals=0,
                bytes_accessed=int(2 * B * C * S_pad * itemsize + B * C * itemsize)),
        )(x3, gate)

    if S_pad != S:
        out3 = out3[:, :, :S]
    return out3.reshape(B, C, D, H, W)


# ---------------------------------------------------------------------------
# Reference & test
# ---------------------------------------------------------------------------

def _reference(x, w1, b1, w2, b2):
    B, C = x.shape[0], x.shape[1]
    pooled = jnp.mean(x, axis=(2, 3, 4))                     # (B, C)
    h = jnp.maximum(pooled @ w1.T + b1, 0.0)                 # (B, Cr)
    g = jax.nn.sigmoid(h @ w2.T + b2)                        # (B, C)
    return x * g.reshape(B, C, 1, 1, 1)


if __name__ == "__main__":
    def linear_params(key, fan_in, fan_out):
        k_w, k_b = jax.random.split(key)
        bound = 1.0 / (fan_in ** 0.5)
        w = jax.random.uniform(k_w, (fan_out, fan_in), jnp.float32, -bound, bound)
        b = jax.random.uniform(k_b, (fan_out,), jnp.float32, -bound, bound)
        return w, b

    key = jax.random.PRNGKey(0)
    kx1, kx2, kp1, kp2 = jax.random.split(key, 4)

    B, C = 2, 8
    Cr = C // 2                                   # reduction_ratio = 2
    w1, b1 = linear_params(kp1, C, Cr)            # fc1: (Cr, C), (Cr,)
    w2, b2 = linear_params(kp2, Cr, C)            # fc2: (C, Cr), (C,)

    # Case 1: lane-aligned spatial size -> fused single-pass path.
    x1 = jax.random.normal(kx1, (B, C, 8, 8, 8), jnp.float32)
    out1 = jax.block_until_ready(channel_se_layer_3d(x1, w1, b1, w2, b2))
    ref1 = _reference(x1, w1, b1, w2, b2)
    assert out1.shape == x1.shape
    assert jnp.allclose(out1, ref1, atol=1e-5, rtol=1e-5), "fused path mismatch"

    # Case 2: non-128-multiple spatial size (7^3 = 343); force the tiled
    # pool/gate/scale path with multi-tile spatial reduction + zero padding.
    x2 = jax.random.normal(kx2, (B, C, 7, 7, 7), jnp.float32)
    out2 = jax.block_until_ready(
        channel_se_layer_3d(x2, w1, b1, w2, b2,
                            spatial_tile=128, max_fused_block_bytes=0))
    ref2 = _reference(x2, w1, b1, w2, b2)
    assert out2.shape == x2.shape
    assert jnp.allclose(out2, ref2, atol=1e-5, rtol=1e-5), "tiled path mismatch"

    print("KERNEL_OK")
</pallas_src>

<mosaic_0001>
module attributes {stable_mosaic.version = 11 : i64} {
  func.func @_fused_kernel(%arg0: i32, %arg1: memref<1x8x512xf32, #tpu.memory_space<vmem>>, %arg2: memref<8x4xf32, #tpu.memory_space<vmem>>, %arg3: memref<1x4xf32, #tpu.memory_space<vmem>>, %arg4: memref<4x8xf32, #tpu.memory_space<vmem>>, %arg5: memref<1x8xf32, #tpu.memory_space<vmem>>, %arg6: memref<1x8x512xf32, #tpu.memory_space<vmem>>) attributes {dimension_semantics = [#tpu.dimension_semantics<parallel>], iteration_bounds = array<i64: 2>, scalar_prefetch = 0 : i64, scratch_operands = 0 : i64, tpu.core_type = #tpu.core_type<tc>, window_params = [{transform_indices = @transform_0, window_bounds = array<i64: 1, 8, 512>}, {pipeline_mode = #tpu.pipeline_mode<synchronous>, transform_indices = @transform_1, window_bounds = array<i64: 8, 4>}, {pipeline_mode = #tpu.pipeline_mode<synchronous>, transform_indices = @transform_2, window_bounds = array<i64: 1, 4>}, {pipeline_mode = #tpu.pipeline_mode<synchronous>, transform_indices = @transform_3, window_bounds = array<i64: 4, 8>}, {pipeline_mode = #tpu.pipeline_mode<synchronous>, transform_indices = @transform_4, window_bounds = array<i64: 1, 8>}, {transform_indices = @transform_5, window_bounds = array<i64: 1, 8, 512>}]} {
    %c0 = arith.constant 0 : index
    %c0_0 = arith.constant 0 : index
    %c0_1 = arith.constant 0 : index
    %0 = vector.load %arg1[%c0, %c0_0, %c0_1] : memref<1x8x512xf32, #tpu.memory_space<vmem>>, vector<1x8x512xf32>
    %cst = arith.constant dense<0.000000e+00> : vector<1x8xf32>
    %1 = vector.multi_reduction <add>, %0, %cst [2] : vector<1x8x512xf32> to vector<1x8xf32>
    %c0_2 = arith.constant 0 : index
    %c0_3 = arith.constant 0 : index
    %2 = vector.load %arg2[%c0_2, %c0_3] : memref<8x4xf32, #tpu.memory_space<vmem>>, vector<8x4xf32>
    %cst_4 = arith.constant dense<0.000000e+00> : vector<1x4xf32>
    %3 = tpu.matmul %1, %2, %cst_4 {dimension_numbers = #tpu.dot_dimension_numbers<[1], [0], [0], [1], [0, 0, 1, 1], [], []>} : vector<1x8xf32>, vector<8x4xf32>, vector<1x4xf32> -> vector<1x4xf32>
    %c0_5 = arith.constant 0 : index
    %c0_6 = arith.constant 0 : index
    %4 = vector.load %arg3[%c0_5, %c0_6] : memref<1x4xf32, #tpu.memory_space<vmem>>, vector<1x4xf32>
    %5 = arith.addf %3, %4 : vector<1x4xf32>
    %cst_7 = arith.constant 0.000000e+00 : f32
    %6 = vector.broadcast %cst_7 : f32 to vector<1x4xf32>
    %7 = arith.maximumf %5, %6 : vector<1x4xf32>
    %c0_8 = arith.constant 0 : index
    %c0_9 = arith.constant 0 : index
    %8 = vector.load %arg4[%c0_8, %c0_9] : memref<4x8xf32, #tpu.memory_space<vmem>>, vector<4x8xf32>
    %cst_10 = arith.constant dense<0.000000e+00> : vector<1x8xf32>
    %9 = tpu.matmul %7, %8, %cst_10 {dimension_numbers = #tpu.dot_dimension_numbers<[1], [0], [0], [1], [0, 0, 1, 1], [], []>} : vector<1x4xf32>, vector<4x8xf32>, vector<1x8xf32> -> vector<1x8xf32>
    %c0_11 = arith.constant 0 : index
    %c0_12 = arith.constant 0 : index
    %10 = vector.load %arg5[%c0_11, %c0_12] : memref<1x8xf32, #tpu.memory_space<vmem>>, vector<1x8xf32>
    %11 = arith.addf %9, %10 : vector<1x8xf32>
    %12 = arith.negf %11 : vector<1x8xf32>
    %13 = math.exp %12 : vector<1x8xf32>
    %cst_13 = arith.constant 1.000000e+00 : f32
    %14 = vector.broadcast %cst_13 : f32 to vector<1x8xf32>
    %15 = arith.addf %14, %13 : vector<1x8xf32>
    %16 = arith.divf %14, %15 : vector<1x8xf32>
    %17 = vector.shape_cast %16 : vector<1x8xf32> to vector<1x8x1xf32>
    %18 = vector.broadcast %17 : vector<1x8x1xf32> to vector<1x8x512xf32>
    %19 = arith.mulf %0, %18 : vector<1x8x512xf32>
    %c0_14 = arith.constant 0 : index
    %c0_15 = arith.constant 0 : index
    %c0_16 = arith.constant 0 : index
    %20 = vector.load %arg6[%c0_14, %c0_15, %c0_16] : memref<1x8x512xf32, #tpu.memory_space<vmem>>, vector<1x8x512xf32>
    tpu.vector_store %arg6[%c0_14, %c0_15, %c0_16], %19 {strides = array<i32>} : memref<1x8x512xf32, #tpu.memory_space<vmem>>, vector<1x8x512xf32>,
    return
  }
  func.func @transform_0(%arg0: i32) -> (i32, i32, i32) {
    %c0_i32 = arith.constant 0 : i32
    %c0_i32_0 = arith.constant 0 : i32
    %c0_i32_1 = arith.constant 0 : i32
    return %arg0, %c0_i32, %c0_i32_0 : i32, i32, i32
  }
  func.func @transform_1(%arg0: i32) -> (i32, i32) {
    %c0_i32 = arith.constant 0 : i32
    %c0_i32_0 = arith.constant 0 : i32
    %c0_i32_1 = arith.constant 0 : i32
    return %c0_i32, %c0_i32_0 : i32, i32
  }
  func.func @transform_2(%arg0: i32) -> (i32, i32) {
    %c0_i32 = arith.constant 0 : i32
    %c0_i32_0 = arith.constant 0 : i32
    %c0_i32_1 = arith.constant 0 : i32
    return %c0_i32, %c0_i32_0 : i32, i32
  }
  func.func @transform_3(%arg0: i32) -> (i32, i32) {
    %c0_i32 = arith.constant 0 : i32
    %c0_i32_0 = arith.constant 0 : i32
    %c0_i32_1 = arith.constant 0 : i32
    return %c0_i32, %c0_i32_0 : i32, i32
  }
  func.func @transform_4(%arg0: i32) -> (i32, i32) {
    %c0_i32 = arith.constant 0 : i32
    %c0_i32_0 = arith.constant 0 : i32
    %c0_i32_1 = arith.constant 0 : i32
    return %c0_i32, %c0_i32_0 : i32, i32
  }
  func.func @transform_5(%arg0: i32) -> (i32, i32, i32) {
    %c0_i32 = arith.constant 0 : i32
    %c0_i32_0 = arith.constant 0 : i32
    %c0_i32_1 = arith.constant 0 : i32
    return %arg0, %c0_i32, %c0_i32_0 : i32, i32, i32
  }
}

</mosaic_0001>

<bundles_post_ra>
// kernel: tpu_custom_call.1
= control target key start
LH: loop header
LB: loop body
LE: loop exit
PB: predicated region body
PF: predicated region fallthrough
CT: control target
= control target key end

     0   :  { %10 = vsyncpa [#allocation3], 0  ;;  %s914_s0 = inlined_call_operand.hbm [shape: f32[2,8,512], index: 0, kind: input, shape index: {}]   ;;  %s915_s1 = inlined_call_operand.vmem [shape: f32[8,4], index: 1, kind: input, shape index: {}]   ;;  %s916_s2 = inlined_call_operand.vmem [shape: f32[1,4], index: 2, kind: input, shape index: {}]   ;;  %s917_s3 = inlined_call_operand.vmem [shape: f32[4,8], index: 3, kind: input, shape index: {}]   ;;  %s918_s4 = inlined_call_operand.vmem [shape: f32[1,8], index: 4, kind: input, shape index: {}]   ;;  %s919_s5 = inlined_call_operand.hbm [shape: f32[2,8,512], index: 5, kind: output, shape index: {}]  }
   0x1   :  { %12 = vsyncpa [#allocation3 + $0x1], 0 }
   0x2   :  { %13 = vsyncpa [#allocation4], 0 }
   0x3   :  { %15 = vsyncpa [#allocation4 + $0x1], 0  ;;  %s737_s18 = smov 0   ;;  %s739_s19 = smov 0  }
   0x4   :  { %s741_s20 = smov 0   ;;  %s743_s21 = smov 0  }
   0x5 LB: > { %s758_s22 = sadd.s32 4294967295, %s701_s21   ;;  %s519_s23 = sadd.s32 4294967294, %s701_s21   ;;  %s701_s21 = sphi %s743_s21, %s934_s21   ;;  %s697_s20 = sphi %s741_s20, %s933_s20   ;;  %s693_s19 = sphi %s739_s19, %s932_s19   ;;  %s689_s18 = sphi %s737_s18, %s931_s18  }
   0x6   : > { %s762_s24 = sadd.s32 1, %s701_s21   ;;  %s28_s25 = sadd.s32 1, %s697_s20 }
   0x7   : > { %s25_s26 = ssub.s32 %s701_s21, %s762_s24  ;;  %p35_p0 = scmp.ne.s32.totalorder %s697_s20, %s693_s19 }
   0x8   : > { %p26_p1 = scmp.eq.s32.totalorder %s25_s26, 0  ;;  %p36_p2 = scmp.eq.s32.totalorder %s701_s21, 0 }
   0x9   : > { %p41_p3 = scmp.ne.s32.totalorder %s693_s19, %s689_s18  ;;  %p42_p4 = scmp.eq.s32.totalorder %s758_s22, 0 }
   0xa   : > { %s774_s27 = scalar_select %p26_p1, %s697_s20, %s28_s25  }
   0xb   : > { %p776_p5 = por %p36_p2, %p35_p0  ;;  %p780_p6 = por %p42_p4, %p41_p3 }
   0xc   : > { %p149_p7 = scmp.eq.s32.totalorder %s758_s22, 1  ;;  %p155_p8 = scmp.eq.s32.totalorder %s519_s23, 1 }
   0xd   : > { %p565_p10 = scmp.lt.s32.totalorder %s701_s21, 2  ;;  %s187_s7 = sand.u32 1, %s697_s20  }
   0xe   : > { %p787_p11 = por %p149_p7, %p35_p0  ;;  %p791_p12 = por %p155_p8, %p41_p3 }
   0xf   : > { %s537_s8 = sshll.u32 %s701_s21, 9  ;;  %s522_s9 = sshll.u32 %s187_s7, 5 }
  0x10   : > { %s923_s30 = scalar_select %p787_p11, 1, 0 }
  0x11   : > { %s924_s6 = scalar_select %p791_p12, 1, 0 }
  0x12   : > { %s800_s12 = scalar_lea.hbm %s914_s0, %s537_s8  ;;  %s191_s13 = scalar_lea.vmem [#allocation2], %s522_s9 }
  0x13   : > { %s199_s14 = sshll.u32 %s191_s13, 4  ;;  %p804_p13 = pnand %p565_p10, %p776_p5  ;;  %s808_s14 = int_to_ptr.vmem [resolvable:$true] %s199_s14 }
  0x14   : > { %s188_s16 = scalar_lea.sflag [#allocation3], %s187_s7  ;;  %s605_s17 = scalar_lea.hbm %s800_s12, 512 }
  0x15   : > { %p606_p2 = scmp.ne.s32.totalorder %s800_s12, %s605_s17  ;;  %p607_p3 = pneg %p804_p13 }
  0x16   : > { %s610_s26 = scalar_lea.hbm %s914_s0, 1024  ;;  %p611_p5 = scmp.lt.u32.totalorder %s800_s12, %s914_s0 }
  0x17   : > { %p608_p4 = pnand %p607_p3, %p606_p2  ;;  %p612_p8 = scmp.lt.u32.totalorder %s610_s26, %s605_s17 }
  0x18   : > { %p614_p9 = scmp.lt.u32.totalorder %s605_s17, %s800_s12 }
  0x19   : > { %p609_p7 = pneg %p608_p4  ;;  %p613_p10 = por %p612_p8, %p611_p5 }
  0x1b   : > { %p615_p0 = por %p614_p9, %p613_p10 }
  0x1d   : > { %p616_p1 = pnand %p615_p0, %p609_p7 }
  0x1f   : > { %619 = shalt.err (!%p616_p1)
}
  0x20   : > { %s620_s7 = scalar_lea.vmem %s808_s14, 512  ;;  %s703_s9 = smov [#allocation2]  }
  0x21   : > { %p621_p2 = scmp.ne.s32.totalorder %s808_s14, %s620_s7  ;;  %s625_s10 = sshll.u32 %s703_s9, 4  ;;  %s626_s10 = int_to_ptr.vmem [resolvable:$false] %s625_s10 }
  0x22   : > { %s627_s11 = scalar_lea.vmem %s626_s10, 1024  ;;  %p628_p11 = scmp.lt.s32.totalorder %s808_s14, %s626_s10 }
  0x23   : > { %p623_p4 = pnand %p621_p2, %p607_p3  ;;  %p629_p5 = scmp.lt.s32.totalorder %s627_s11, %s620_s7 }
  0x25   : > { %p624_p12 = pneg %p623_p4  ;;  %p630_p8 = por %p629_p5, %p628_p11 }
  0x27   : > { %p631_p9 = pnand %p630_p8, %p624_p12 }
  0x29   : > { %634 = shalt.err (!%p631_p9)
}
  0x2a   : > { %560 = dma.hbm_to_vmem [thread:$0]  (!%p804_p13), %s800_s12, 512, %s808_s14, %s188_s16  }
  0x2b   : > { %p926_p0 = scmp.lt.s32.totalorder %s701_s21, 3  ;;  %p927_p1 = scmp.ge.s32.totalorder %s701_s21, 1 }
  0x2d   : > { %p205_p3 = pnand %p927_p1, %p926_p0 }
  0x2e   : > { %s842_s13 = sand.u32 (!%p205_p3), 1, %s693_s19  }
  0x2f   : > { %208 = sbr.rel (%p205_p3) target bundleno = 796 (0x31c), region = 40  ;;  %s526_s17 = sshll.u32 (!%p205_p3), %s842_s13, 5 }
  0x30   : > { %s211_s23 = scalar_lea.sflag (!%p205_p3), [#allocation3], %s842_s13  ;;  %s214_s15 = scalar_lea.vmem (!%p205_p3), [#allocation2], %s526_s17 }
  0x36   : > { %680 = dma.done.wait (%p780_p6), %s211_s23, 512  }
  0x37   : > { %682 = vsyncadd (%p780_p6), %s211_s23, 4294966784  ;;  %v241_v0 = vld [vmem:[%s214_s15] sm:$0xff]  ;;  %v242_v1 = vld [vmem:[%s214_s15 + $0x8] sm:$0xff]  ;;  %v704_v7 = vmov 0.0   ;;  %vm705_vm0 = vmmov 0   ;;  %v253_v9 = vlaneseq  ;;  %vm259_vm1 = vcmask 64512  }
  0x38   : > { %v243_v2 = vld [vmem:[%s214_s15 + $0x10] sm:$0xff]  ;;  %v245_v3 = vadd.f32 %v242_v1, %v241_v0  ;;  %v244_v4 = vld [vmem:[%s214_s15 + $0x18] sm:$0xff]  ;;  %543 = vmatprep.subr.mxu0 %v704_v7  ;;  %v250_v8 = vld [vmem:[%s915_s1] sm:$0xff]  ;;  %548 = vmatprep.subr.mxu1 %v704_v7  ;;  %vm339_vm2 = vcmask 1043456   ;;  %vm335_vm3 = vcmask 31744   ;;  %s538_s7 = sshll.u32 %s758_s22, 9 }
  0x39   : > { %544 = vmatpush3.msra.mxu0 %v250_v8  ;;  %545 = vmatprep.mubr.msk.f32.mxu0 %vm705_vm0, %v704_v7  ;;  %v254_v10 = vand.u32 127, %v253_v9  ;;  %v256_v11 = vshrl.u32 %v253_v9, 7  ;;  %v333_v15 = vld [vmem:[%s917_s3] sm:$0xf]  ;;  %s240_s9 = scalar_lea.vmem [#allocation5], %s526_s17  ;;  %s870_s15 = scalar_lea.hbm %s919_s5, %s538_s7 }
  0x3a   : > { %v246_v5 = vadd.f32 %v245_v3, %v243_v2  ;;  %550 = vmatprep.mubr.msk.f32.mxu1 %vm705_vm0, %v704_v7  ;;  %549 = vmatpush3.msk.msra.mxu1 %vm339_vm2, %v333_v15  ;;  %v251_v16 = vld [vmem:[%s916_s2] sm:$0x1]  ;;  %s449_s10 = sshll.u32 %s240_s9, 4  ;;  %s435_s22 = scalar_lea.sflag [#allocation4], %s842_s13  ;;  %s872_s10 = int_to_ptr.vmem [resolvable:$true] %s449_s10 }
  0x3b   : > { %v257_v12 = vsub.s32 %v254_v10, %v256_v11  ;;  %v334_v21 = vld [vmem:[%s918_s4] sm:$0x1]  ;;  %v421_v28 = vsub.s32 0, %v256_v11  ;;  %s635_s17 = scalar_lea.vmem %s872_s10, 512  ;;  %p928_p11 = scmp.ne.s32.totalorder %s923_s30, 0 }
  0x3c   : > { %v247_v6 = vadd.f32 %v246_v5, %v244_v4  ;;  %p636_p6 = scmp.ne.s32.totalorder %s872_s10, %s635_s17  ;;  %s706_s12 = smov [#allocation5]  }
  0x3d   : > { %s639_s14 = sshll.u32 %s706_s12, 4  ;;  %s640_s14 = int_to_ptr.vmem [resolvable:$false] %s639_s14 }
  0x3e   : > { %248 = vadd.xlane.f32.xlu0 %v247_v6  ;;  %p637_p12 = pnand %p636_p6, %p928_p11  ;;  %s641_s29 = scalar_lea.vmem %s640_s14, 1024 }
  0x3f   : > { %p642_p7 = scmp.lt.s32.totalorder %s872_s10, %s640_s14  ;;  %p643_p10 = scmp.lt.s32.totalorder %s641_s29, %s635_s17 }
  0x40   : > { %p638_p13 = pneg %p637_p12 }
  0x41   : > { %p644_p2 = por %p643_p10, %p642_p7 }
  0x43   : > { %p645_p4 = pnand %p644_p2, %p638_p13 }
  0xcb   : > { %v249_v13 = vpop.xlane.xlu0 %248 }
  0xcc   : > { %v258_v14 = vrot.slane %v249_v13, %v257_v12 }
  0xce   : > { %546 = vmatmul.mubr.msk.f32.vlgmr.msra.gmra.mrb[0].mxu0 %vm259_vm1, %v258_v14 }
 0x1a1   : > { %v328_v17 = vpop.f32.mrb[0].mxu0 }
 0x1a2   : > { %v329_v18 = vadd.f32 %v328_v17, %v251_v16  ;;  %v547_v19 = vpop.f32.mrb[1].mxu0 }
 0x1a4   : > { %v332_v20 = vmax.f32 %v329_v18, 0.0 }
 0x1a6   : > { %551 = vmatmul.mubr.msk.f32.vlgmr.msra.gmra.mrb[0].mxu1 %vm335_vm3, %v332_v20 }
 0x279   : > { %v409_v22 = vpop.f32.mrb[0].mxu1 }
 0x27a   : > { %v410_v23 = vadd.f32 %v409_v22, %v334_v21  ;;  %v552_v24 = vpop.f32.mrb[1].mxu1 }
 0x27c   : > { %v531_v25 = vmul.f32 -1.442695, %v410_v23 }
 0x27e   : > { %601 = vpow2.f32 %v531_v25 }
 0x288   : > { %v602_v26 = vpop.eup %601 }
 0x289   : > { %v416_v27 = vadd.f32 1.0, %v602_v26 }
 0x28b   : > { %603 = vrcp.f32 %v416_v27 }
 0x295   : > { %v604_v29 = vpop.eup %603 }
 0x296   : > { %v422_v30 = vrot.slane %v604_v29, %v421_v28 }
 0x298   : > { %424 = vbcast.lane.b32.xlu0 %v422_v30, 256 }
 0x30a   : > { %v425_v31 = vpop.permute.xlu0 %424 }
 0x30b   : > { %v426_v32 = vmul.f32 %v425_v31, %v241_v0  ;;  %v427_v33 = vmul.f32 %v425_v31, %v242_v1  ;;  %v428_v34 = vmul.f32 %v425_v31, %v243_v2  ;;  %v429_v35 = vmul.f32 %v425_v31, %v244_v4 }
 0x30d   : > { %430 = vst [vmem:[%s240_s9] sm:$0xff] %v426_v32  ;;  %431 = vst [vmem:[%s240_s9 + $0x8] sm:$0xff] %v427_v33 }
 0x30e   : > { %432 = vst [vmem:[%s240_s9 + $0x10] sm:$0xff] %v428_v34  ;;  %433 = vst [vmem:[%s240_s9 + $0x18] sm:$0xff] %v429_v35 }
 0x30f   : > { %648 = shalt.err (!%p645_p4)
}
 0x310   : > { %s649_s13 = scalar_lea.hbm %s870_s15, 512  ;;  %s653_s26 = scalar_lea.hbm %s919_s5, 1024 }
 0x311   : > { %p650_p5 = scmp.ne.s32.totalorder %s870_s15, %s649_s13  ;;  %p654_p0 = scmp.lt.u32.totalorder %s870_s15, %s919_s5 }
 0x312   : > { %p655_p1 = scmp.lt.u32.totalorder %s653_s26, %s649_s13  ;;  %p657_p6 = scmp.lt.u32.totalorder %s649_s13, %s870_s15 }
 0x313   : > { %p651_p8 = pnand %p650_p5, %p928_p11 }
 0x314   : > { %p656_p3 = por %p655_p1, %p654_p0 }
 0x315   : > { %p652_p9 = pneg %p651_p8 }
 0x316   : > { %p658_p12 = por %p657_p6, %p656_p3 }
 0x318   : > { %p659_p13 = pnand %p658_p12, %p652_p9 }
 0x31a   : > { %662 = shalt.err (!%p659_p13)
}
 0x31b   : > { %555 = dma.vmem_to_hbm [thread:$0]  (%p928_p11), %s872_s10, 512, %s870_s15, %s435_s22  }
 0x31c PF: > { %s461_s7 = sand.u32 1, %s689_s18   ;;  %p929_p7 = scmp.ne.s32.totalorder %s924_s6, 0 }
 0x31d   : > { %p930_p10 = scmp.ge.s32.totalorder %s701_s21, 2  ;;  %s462_s9 = scalar_lea.sflag [#allocation4], %s461_s7 }
 0x31f   : > { %p562_p2 = pnand %p930_p10, %p929_p7 }
 0x321   : > { %684 = dma.done.wait (!%p562_p2), %s462_s9, 512  }
 0x322   : > { %686 = vsyncadd (!%p562_p2), %s462_s9, 4294966784  ;;  %p18_p4 = scmp.ge.s32.totalorder %s762_s24, 4   ;;  %s931_s18 = smov %s693_s19 }
 0x323   : > { %s932_s19 = smov %s697_s20  ;;  %s933_s20 = smov %s774_s27 }
 0x324   : > { %s934_s21 = smov %s762_s24  ;;  %20 = sbr.rel (!%p18_p4) target bundleno = 5 (0x5), region = 85 }
 0x32b   :  { %467 = vsyncpa [#allocation3], 1 }
 0x32c   :  { %469 = vsyncpa [#allocation3 + $0x1], 1 }
 0x32d   :  { %470 = vsyncpa [#allocation4], 1 }
 0x32e   :  { %472 = vsyncpa [#allocation4 + $0x1], 1 }

</bundles_post_ra>
